<compile_context>
chip_gen: v7x
topology: tpu7x:2x2x1
jax: 0.10.0
libtpu: 0.0.40
codegen_flags: <defaults>
</compile_context>

<pallas_src>
import functools

import jax
import jax.numpy as jnp
from jax.experimental import pallas as pl
from jax.experimental.pallas import tpu as pltpu


def _round_up(n, m):
    return ((n + m - 1) // m) * m


def vae_kernel(x_ref, eps_ref,
               w1_ref, b1_ref,
               wmv_ref, bmv_ref,
               w3_ref, b3_ref,
               w4_ref, b4_ref,
               recon_ref, muvar_ref):
    L = eps_ref.shape[1]
    cdt = w1_ref.dtype  # MXU input dtype (float32 or bfloat16); accumulation is f32.

    x = x_ref[...].astype(cdt)

    # encode: h = relu(x @ W1 + b1)
    h = jnp.dot(x, w1_ref[...], preferred_element_type=jnp.float32) + b1_ref[...]
    h = jnp.maximum(h, 0.0)

    # fused mu/logvar head: one matmul into (TB, 2L), sliced below.
    muvar = (jnp.dot(h.astype(cdt), wmv_ref[...], preferred_element_type=jnp.float32)
             + bmv_ref[...])
    mu = muvar[:, :L]
    logvar = muvar[:, L:]

    # reparameterize: z = mu + eps * exp(0.5 * logvar)   (eps supplied by the host; f32 math)
    z = mu + eps_ref[...].astype(jnp.float32) * jnp.exp(0.5 * logvar)

    # decode: recon = relu(z @ W3 + b3) @ W4 + b4
    h2 = jnp.dot(z.astype(cdt), w3_ref[...], preferred_element_type=jnp.float32) + b3_ref[...]
    h2 = jnp.maximum(h2, 0.0)
    recon = jnp.dot(h2.astype(cdt), w4_ref[...], preferred_element_type=jnp.float32) + b4_ref[...]

    recon_ref[...] = recon.astype(recon_ref.dtype)
    muvar_ref[...] = muvar.astype(muvar_ref.dtype)


def _vmem_estimate_bytes(TB, D_in, H, L, params):
    # resident weights (assume double-buffered) + double-buffered batch tiles + activation slack
    wbytes = sum(int(v.size) * v.dtype.itemsize for v in params.values())
    tile_bytes = TB * (D_in + L + D_in + 2 * L) * 4        # x, eps, recon, muvar (f32)
    act_bytes = 4 * TB * H * 4                              # h / h2 / temporaries headroom
    return 2 * wbytes + 2 * tile_bytes + act_bytes


@functools.partial(jax.jit, static_argnames=("block_b",))
def vae_forward(x, eps, params, *, block_b=512):
    """Returns (recon, mu, logvar). params holds w1,b1,wmv,bmv,w3,b3,w4,b4."""
    B, D_in = x.shape
    H = params["w1"].shape[1]
    L2 = params["wmv"].shape[1]
    L = L2 // 2

    # Batch tile: multiple of 8 sublanes; largest tile <= block_b that covers the batch.
    TB = min(block_b, _round_up(B, 8))
    n_tiles = pl.cdiv(B, TB)
    B_pad = n_tiles * TB
    if B_pad != B:
        x = jnp.pad(x, ((0, B_pad - B), (0, 0)))
        eps = jnp.pad(eps, ((0, B_pad - B), (0, 0)))

    def row_spec(feat):
        return pl.BlockSpec((TB, feat), lambda i: (i, 0))

    def const_spec(shape):
        # Constant block index -> weight/bias tile stays resident, DMA'd only once.
        return pl.BlockSpec(shape, lambda i: (0, 0))

    # Size the tile against v7x's 64 MiB physical / 32 MiB default-scoped VMEM.
    est = _vmem_estimate_bytes(TB, D_in, H, L, params)
    ckw = dict(dimension_semantics=("parallel",))
    if est > 32 * 1024 * 1024:
        ckw["vmem_limit_bytes"] = min(int(est * 1.5), 60 * 1024 * 1024)
    compiler_params = pltpu.CompilerParams(**ckw)

    recon, muvar = pl.pallas_call(
        vae_kernel,
        grid=(n_tiles,),
        out_shape=(
            jax.ShapeDtypeStruct((B_pad, D_in), jnp.float32),
            jax.ShapeDtypeStruct((B_pad, L2), jnp.float32),   # packed [mu | logvar]
        ),
        in_specs=[
            row_spec(D_in),                       # x
            row_spec(L),                          # eps
            const_spec(params["w1"].shape), const_spec(params["b1"].shape),
            const_spec(params["wmv"].shape), const_spec(params["bmv"].shape),
            const_spec(params["w3"].shape), const_spec(params["b3"].shape),
            const_spec(params["w4"].shape), const_spec(params["b4"].shape),
        ],
        out_specs=(row_spec(D_in), row_spec(L2)),
        compiler_params=compiler_params,
    )(
        x, eps,
        params["w1"], params["b1"],
        params["wmv"], params["bmv"],
        params["w3"], params["b3"],
        params["w4"], params["b4"],
    )

    recon = recon[:B]
    mu = muvar[:B, :L]
    logvar = muvar[:B, L:]
    return recon, mu, logvar


def init_params(key, input_dim, hidden_dim, latent_dim, param_dtype=jnp.float32):
    """Synthetic parameters mirroring the torch module (fc_mu / fc_logvar fused into wmv)."""
    ks = jax.random.split(key, 10)

    def lin(kw, kb, fan_in, fan_out):
        # torch.nn.Linear default init: U(-1/sqrt(fan_in), 1/sqrt(fan_in))
        bound = 1.0 / jnp.sqrt(fan_in)
        w = jax.random.uniform(kw, (fan_in, fan_out), jnp.float32, -bound, bound)
        b = jax.random.uniform(kb, (1, fan_out), jnp.float32, -bound, bound)
        return w, b

    w1, b1 = lin(ks[0], ks[1], input_dim, hidden_dim)
    wmu, bmu = lin(ks[2], ks[3], hidden_dim, latent_dim)
    wlv, blv = lin(ks[4], ks[5], hidden_dim, latent_dim)
    w3, b3 = lin(ks[6], ks[7], latent_dim, hidden_dim)
    w4, b4 = lin(ks[8], ks[9], hidden_dim, input_dim)

    wmv = jnp.concatenate([wmu, wlv], axis=1)    # (H, 2L)
    bmv = jnp.concatenate([bmu, blv], axis=1)    # (1, 2L)

    p = dict(w1=w1, b1=b1, wmv=wmv, bmv=bmv, w3=w3, b3=b3, w4=w4, b4=b4)
    # Weights optionally bf16 (halves HBM traffic on v6e/v7x); biases stay f32.
    return {k: (v.astype(param_dtype) if k.startswith("w") else v) for k, v in p.items()}


def vae_forward_ref(x, eps, p):
    """Pure-JAX reference (f32 math on the stored parameter values)."""
    w1 = p["w1"].astype(jnp.float32); wmv = p["wmv"].astype(jnp.float32)
    w3 = p["w3"].astype(jnp.float32); w4 = p["w4"].astype(jnp.float32)
    L = p["wmv"].shape[1] // 2
    h = jax.nn.relu(x @ w1 + p["b1"])
    muvar = h @ wmv + p["bmv"]
    mu, logvar = muvar[:, :L], muvar[:, L:]
    z = mu + eps * jnp.exp(0.5 * logvar)
    h2 = jax.nn.relu(z @ w3 + p["b3"])
    recon = h2 @ w4 + p["b4"]
    return recon, mu, logvar


if __name__ == "__main__":
    key = jax.random.PRNGKey(0)
    kp, kx, ke, kx2, ke2 = jax.random.split(key, 5)

    batch, input_dim, hidden_dim, latent_dim = 8, 32, 64, 8

    # --- small-shape f32 check (matches the torch module's toy sizes) ---
    params = init_params(kp, input_dim, hidden_dim, latent_dim, jnp.float32)
    x = jax.random.normal(kx, (batch, input_dim), jnp.float32)
    eps = jax.random.normal(ke, (batch, latent_dim), jnp.float32)  # torch.randn_like(std)

    recon, mu, logvar = vae_forward(x, eps, params)
    jax.block_until_ready((recon, mu, logvar))
    r_ref, mu_ref, lv_ref = vae_forward_ref(x, eps, params)
    assert jnp.allclose(recon, r_ref, atol=1e-4, rtol=1e-4)
    assert jnp.allclose(mu, mu_ref, atol=1e-4, rtol=1e-4)
    assert jnp.allclose(logvar, lv_ref, atol=1e-4, rtol=1e-4)

    # --- larger, non-multiple batch: exercises the pipelined grid + padding + parallel axis ---
    B2 = 1000
    x2 = jax.random.normal(kx2, (B2, input_dim), jnp.float32)
    eps2 = jax.random.normal(ke2, (B2, latent_dim), jnp.float32)
    r2, m2, l2 = vae_forward(x2, eps2, params, block_b=256)
    jax.block_until_ready((r2, m2, l2))
    r2_ref, m2_ref, l2_ref = vae_forward_ref(x2, eps2, params)
    assert jnp.allclose(r2, r2_ref, atol=1e-4, rtol=1e-4)
    assert jnp.allclose(m2, m2_ref, atol=1e-4, rtol=1e-4)
    assert jnp.allclose(l2, l2_ref, atol=1e-4, rtol=1e-4)

    # --- bf16 weights (f32 accumulation) path for v6e/v7x HBM-traffic savings ---
    params_bf16 = init_params(kp, input_dim, hidden_dim, latent_dim, jnp.bfloat16)
    r3, m3, l3 = vae_forward(x2, eps2, params_bf16, block_b=256)
    jax.block_until_ready((r3, m3, l3))
    r3_ref, m3_ref, l3_ref = vae_forward_ref(x2, eps2, params_bf16)
    assert jnp.allclose(r3, r3_ref, atol=1e-1, rtol=1e-1)
    assert jnp.allclose(m3, m3_ref, atol=1e-1, rtol=1e-1)
    assert jnp.allclose(l3, l3_ref, atol=1e-1, rtol=1e-1)

    print("KERNEL_OK")
</pallas_src>

<mosaic_0001>
module attributes {stable_mosaic.version = 11 : i64} {
  func.func @vae_kernel(%arg0: i32, %arg1: memref<8x32xf32, #tpu.memory_space<vmem>>, %arg2: memref<8x8xf32, #tpu.memory_space<vmem>>, %arg3: memref<32x64xf32, #tpu.memory_space<vmem>>, %arg4: memref<1x64xf32, #tpu.memory_space<vmem>>, %arg5: memref<64x16xf32, #tpu.memory_space<vmem>>, %arg6: memref<1x16xf32, #tpu.memory_space<vmem>>, %arg7: memref<8x64xf32, #tpu.memory_space<vmem>>, %arg8: memref<1x64xf32, #tpu.memory_space<vmem>>, %arg9: memref<64x32xf32, #tpu.memory_space<vmem>>, %arg10: memref<1x32xf32, #tpu.memory_space<vmem>>, %arg11: memref<8x32xf32, #tpu.memory_space<vmem>>, %arg12: memref<8x16xf32, #tpu.memory_space<vmem>>) attributes {dimension_semantics = [#tpu.dimension_semantics<parallel>], iteration_bounds = array<i64: 1>, scalar_prefetch = 0 : i64, scratch_operands = 0 : i64, tpu.core_type = #tpu.core_type<tc>, window_params = [{transform_indices = @transform_0, window_bounds = array<i64: 8, 32>}, {transform_indices = @transform_1, window_bounds = array<i64: 8, 8>}, {pipeline_mode = #tpu.pipeline_mode<synchronous>, transform_indices = @transform_2, window_bounds = array<i64: 32, 64>}, {pipeline_mode = #tpu.pipeline_mode<synchronous>, transform_indices = @transform_3, window_bounds = array<i64: 1, 64>}, {pipeline_mode = #tpu.pipeline_mode<synchronous>, transform_indices = @transform_4, window_bounds = array<i64: 64, 16>}, {pipeline_mode = #tpu.pipeline_mode<synchronous>, transform_indices = @transform_5, window_bounds = array<i64: 1, 16>}, {pipeline_mode = #tpu.pipeline_mode<synchronous>, transform_indices = @transform_6, window_bounds = array<i64: 8, 64>}, {pipeline_mode = #tpu.pipeline_mode<synchronous>, transform_indices = @transform_7, window_bounds = array<i64: 1, 64>}, {pipeline_mode = #tpu.pipeline_mode<synchronous>, transform_indices = @transform_8, window_bounds = array<i64: 64, 32>}, {pipeline_mode = #tpu.pipeline_mode<synchronous>, transform_indices = @transform_9, window_bounds = array<i64: 1, 32>}, {transform_indices = @transform_10, window_bounds = array<i64: 8, 32>}, {transform_indices = @transform_11, window_bounds = array<i64: 8, 16>}]} {
    %c0 = arith.constant 0 : index
    %c0_0 = arith.constant 0 : index
    %0 = vector.load %arg1[%c0, %c0_0] : memref<8x32xf32, #tpu.memory_space<vmem>>, vector<8x32xf32>
    %c0_1 = arith.constant 0 : index
    %c0_2 = arith.constant 0 : index
    %1 = vector.load %arg3[%c0_1, %c0_2] : memref<32x64xf32, #tpu.memory_space<vmem>>, vector<32x64xf32>
    %cst = arith.constant dense<0.000000e+00> : vector<8x64xf32>
    %2 = tpu.matmul %0, %1, %cst {dimension_numbers = #tpu.dot_dimension_numbers<[1], [0], [0], [1], [0, 0, 1, 1], [], []>} : vector<8x32xf32>, vector<32x64xf32>, vector<8x64xf32> -> vector<8x64xf32>
    %c0_3 = arith.constant 0 : index
    %c0_4 = arith.constant 0 : index
    %3 = vector.load %arg4[%c0_3, %c0_4] : memref<1x64xf32, #tpu.memory_space<vmem>>, vector<1x64xf32>
    %4 = vector.broadcast %3 : vector<1x64xf32> to vector<8x64xf32>
    %5 = arith.addf %2, %4 : vector<8x64xf32>
    %cst_5 = arith.constant 0.000000e+00 : f32
    %6 = vector.broadcast %cst_5 : f32 to vector<8x64xf32>
    %7 = arith.maximumf %5, %6 : vector<8x64xf32>
    %c0_6 = arith.constant 0 : index
    %c0_7 = arith.constant 0 : index
    %8 = vector.load %arg5[%c0_6, %c0_7] : memref<64x16xf32, #tpu.memory_space<vmem>>, vector<64x16xf32>
    %cst_8 = arith.constant dense<0.000000e+00> : vector<8x16xf32>
    %9 = tpu.matmul %7, %8, %cst_8 {dimension_numbers = #tpu.dot_dimension_numbers<[1], [0], [0], [1], [0, 0, 1, 1], [], []>} : vector<8x64xf32>, vector<64x16xf32>, vector<8x16xf32> -> vector<8x16xf32>
    %c0_9 = arith.constant 0 : index
    %c0_10 = arith.constant 0 : index
    %10 = vector.load %arg6[%c0_9, %c0_10] : memref<1x16xf32, #tpu.memory_space<vmem>>, vector<1x16xf32>
    %11 = vector.broadcast %10 : vector<1x16xf32> to vector<8x16xf32>
    %12 = arith.addf %9, %11 : vector<8x16xf32>
    %13 = vector.extract_strided_slice %12 {offsets = [0, 0], sizes = [8, 8], strides = [1, 1]} : vector<8x16xf32> to vector<8x8xf32>
    %14 = vector.extract_strided_slice %12 {offsets = [0, 8], sizes = [8, 8], strides = [1, 1]} : vector<8x16xf32> to vector<8x8xf32>
    %c0_11 = arith.constant 0 : index
    %c0_12 = arith.constant 0 : index
    %15 = vector.load %arg2[%c0_11, %c0_12] : memref<8x8xf32, #tpu.memory_space<vmem>>, vector<8x8xf32>
    %cst_13 = arith.constant 5.000000e-01 : f32
    %16 = vector.broadcast %cst_13 : f32 to vector<8x8xf32>
    %17 = arith.mulf %16, %14 : vector<8x8xf32>
    %18 = math.exp %17 : vector<8x8xf32>
    %19 = arith.mulf %15, %18 : vector<8x8xf32>
    %20 = arith.addf %13, %19 : vector<8x8xf32>
    %c0_14 = arith.constant 0 : index
    %c0_15 = arith.constant 0 : index
    %21 = vector.load %arg7[%c0_14, %c0_15] : memref<8x64xf32, #tpu.memory_space<vmem>>, vector<8x64xf32>
    %cst_16 = arith.constant dense<0.000000e+00> : vector<8x64xf32>
    %22 = tpu.matmul %20, %21, %cst_16 {dimension_numbers = #tpu.dot_dimension_numbers<[1], [0], [0], [1], [0, 0, 1, 1], [], []>} : vector<8x8xf32>, vector<8x64xf32>, vector<8x64xf32> -> vector<8x64xf32>
    %c0_17 = arith.constant 0 : index
    %c0_18 = arith.constant 0 : index
    %23 = vector.load %arg8[%c0_17, %c0_18] : memref<1x64xf32, #tpu.memory_space<vmem>>, vector<1x64xf32>
    %24 = vector.broadcast %23 : vector<1x64xf32> to vector<8x64xf32>
    %25 = arith.addf %22, %24 : vector<8x64xf32>
    %cst_19 = arith.constant 0.000000e+00 : f32
    %26 = vector.broadcast %cst_19 : f32 to vector<8x64xf32>
    %27 = arith.maximumf %25, %26 : vector<8x64xf32>
    %c0_20 = arith.constant 0 : index
    %c0_21 = arith.constant 0 : index
    %28 = vector.load %arg9[%c0_20, %c0_21] : memref<64x32xf32, #tpu.memory_space<vmem>>, vector<64x32xf32>
    %cst_22 = arith.constant dense<0.000000e+00> : vector<8x32xf32>
    %29 = tpu.matmul %27, %28, %cst_22 {dimension_numbers = #tpu.dot_dimension_numbers<[1], [0], [0], [1], [0, 0, 1, 1], [], []>} : vector<8x64xf32>, vector<64x32xf32>, vector<8x32xf32> -> vector<8x32xf32>
    %c0_23 = arith.constant 0 : index
    %c0_24 = arith.constant 0 : index
    %30 = vector.load %arg10[%c0_23, %c0_24] : memref<1x32xf32, #tpu.memory_space<vmem>>, vector<1x32xf32>
    %31 = vector.broadcast %30 : vector<1x32xf32> to vector<8x32xf32>
    %32 = arith.addf %29, %31 : vector<8x32xf32>
    %c0_25 = arith.constant 0 : index
    %c0_26 = arith.constant 0 : index
    %33 = vector.load %arg11[%c0_25, %c0_26] : memref<8x32xf32, #tpu.memory_space<vmem>>, vector<8x32xf32>
    tpu.vector_store %arg11[%c0_25, %c0_26], %32 {strides = array<i32>} : memref<8x32xf32, #tpu.memory_space<vmem>>, vector<8x32xf32>,
    %c0_27 = arith.constant 0 : index
    %c0_28 = arith.constant 0 : index
    %34 = vector.load %arg12[%c0_27, %c0_28] : memref<8x16xf32, #tpu.memory_space<vmem>>, vector<8x16xf32>
    tpu.vector_store %arg12[%c0_27, %c0_28], %12 {strides = array<i32>} : memref<8x16xf32, #tpu.memory_space<vmem>>, vector<8x16xf32>,
    return
  }
  func.func @transform_0(%arg0: i32) -> (i32, i32) {
    %c0_i32 = arith.constant 0 : i32
    %c0_i32_0 = arith.constant 0 : i32
    return %arg0, %c0_i32 : i32, i32
  }
  func.func @transform_1(%arg0: i32) -> (i32, i32) {
    %c0_i32 = arith.constant 0 : i32
    %c0_i32_0 = arith.constant 0 : i32
    return %arg0, %c0_i32 : i32, i32
  }
  func.func @transform_2(%arg0: i32) -> (i32, i32) {
    %c0_i32 = arith.constant 0 : i32
    %c0_i32_0 = arith.constant 0 : i32
    %c0_i32_1 = arith.constant 0 : i32
    return %c0_i32, %c0_i32_0 : i32, i32
  }
  func.func @transform_3(%arg0: i32) -> (i32, i32) {
    %c0_i32 = arith.constant 0 : i32
    %c0_i32_0 = arith.constant 0 : i32
    %c0_i32_1 = arith.constant 0 : i32
    return %c0_i32, %c0_i32_0 : i32, i32
  }
  func.func @transform_4(%arg0: i32) -> (i32, i32) {
    %c0_i32 = arith.constant 0 : i32
    %c0_i32_0 = arith.constant 0 : i32
    %c0_i32_1 = arith.constant 0 : i32
    return %c0_i32, %c0_i32_0 : i32, i32
  }
  func.func @transform_5(%arg0: i32) -> (i32, i32) {
    %c0_i32 = arith.constant 0 : i32
    %c0_i32_0 = arith.constant 0 : i32
    %c0_i32_1 = arith.constant 0 : i32
    return %c0_i32, %c0_i32_0 : i32, i32
  }
  func.func @transform_6(%arg0: i32) -> (i32, i32) {
    %c0_i32 = arith.constant 0 : i32
    %c0_i32_0 = arith.constant 0 : i32
    %c0_i32_1 = arith.constant 0 : i32
    return %c0_i32, %c0_i32_0 : i32, i32
  }
  func.func @transform_7(%arg0: i32) -> (i32, i32) {
    %c0_i32 = arith.constant 0 : i32
    %c0_i32_0 = arith.constant 0 : i32
    %c0_i32_1 = arith.constant 0 : i32
    return %c0_i32, %c0_i32_0 : i32, i32
  }
  func.func @transform_8(%arg0: i32) -> (i32, i32) {
    %c0_i32 = arith.constant 0 : i32
    %c0_i32_0 = arith.constant 0 : i32
    %c0_i32_1 = arith.constant 0 : i32
    return %c0_i32, %c0_i32_0 : i32, i32
  }
  func.func @transform_9(%arg0: i32) -> (i32, i32) {
    %c0_i32 = arith.constant 0 : i32
    %c0_i32_0 = arith.constant 0 : i32
    %c0_i32_1 = arith.constant 0 : i32
    return %c0_i32, %c0_i32_0 : i32, i32
  }
  func.func @transform_10(%arg0: i32) -> (i32, i32) {
    %c0_i32 = arith.constant 0 : i32
    %c0_i32_0 = arith.constant 0 : i32
    return %arg0, %c0_i32 : i32, i32
  }
  func.func @transform_11(%arg0: i32) -> (i32, i32) {
    %c0_i32 = arith.constant 0 : i32
    %c0_i32_0 = arith.constant 0 : i32
    return %arg0, %c0_i32 : i32, i32
  }
}

</mosaic_0001>

<bundles_post_ra>
// kernel: vae_forward.1
= control target key start
LH: loop header
LB: loop body
LE: loop exit
PB: predicated region body
PF: predicated region fallthrough
CT: control target
= control target key end

     0   :  { %v564_v3 = vmov 0.0|0.0   ;;  %vm565_vm0 = vmmov 0   ;;  %v566_v6 = vmov 0.0   ;;  %s748_s0 = inlined_call_operand.vmem [shape: f32[8,32], index: 0, kind: input, shape index: {}]   ;;  %s749_s1 = inlined_call_operand.vmem [shape: f32[8,8], index: 1, kind: input, shape index: {}]   ;;  %s750_s2 = inlined_call_operand.vmem [shape: f32[32,64], index: 2, kind: input, shape index: {}]   ;;  %s751_s3 = inlined_call_operand.vmem [shape: f32[1,64], index: 3, kind: input, shape index: {}]   ;;  %s752_s4 = inlined_call_operand.vmem [shape: f32[64,16], index: 4, kind: input, shape index: {}]   ;;  %s753_s5 = inlined_call_operand.vmem [shape: f32[1,16], index: 5, kind: input, shape index: {}]   ;;  %s754_s6 = inlined_call_operand.vmem [shape: f32[8,64], index: 6, kind: input, shape index: {}]   ;;  %s755_s7 = inlined_call_operand.vmem [shape: f32[1,64], index: 7, kind: input, shape index: {}]   ;;  %s756_s8 = inlined_call_operand.vmem [shape: f32[64,32], index: 8, kind: input, shape index: {}]   ;;  %s757_s9 = inlined_call_operand.vmem [shape: f32[1,32], index: 9, kind: input, shape index: {}]   ;;  %s758_s10 = inlined_call_operand.hbm [shape: f32[8,32], index: 10, kind: output, shape index: {0}]   ;;  %s759_s11 = inlined_call_operand.vmem [shape: f32[8,16], index: 11, kind: output, shape index: {1}]  }
   0x1   :  { %v39_v0 = vld [vmem:[%s750_s2] sm:$0xff]  ;;  %v40_v1 = vld [vmem:[%s750_s2 + $0x8] sm:$0xff]  ;;  %v41_v2 = vld [vmem:[%s750_s2 + $0x10] sm:$0xff]  ;;  %503 = vmatprep.subr.bf16.mxu1 %v564_v3  ;;  %457 = vmatprep.mubr.msk.f32.mxu1 %vm565_vm0, %v566_v6 }
   0x2   :  { %v504_v4 = vpack.c.bf16 %v40_v1, %v39_v0  ;;  %v42_v5 = vld [vmem:[%s750_s2 + $0x18] sm:$0xff]  ;;  %479 = vmatprep.subr.mxu0 %v566_v6  ;;  %481 = vmatprep.mubr.msk.f32.mxu0 %vm565_vm0, %v566_v6  ;;  %v125_v8 = vld [vmem:[%s752_s4] sm:$0xff]  ;;  %v126_v9 = vld [vmem:[%s752_s4 + $0x8] sm:$0xff] }
   0x3   :  { %v507_v7 = vpack.c.bf16 %v42_v5, %v41_v2 }
   0x4   :  { %505 = vmatpush3.bf16.msra.mxu1 %v504_v4 }
   0x5   :  { %506 = vmatprep.subr.bf16.mxu1 %v564_v3 }
   0x6   :  { %17 = vsyncpa [#allocation3], 0  ;;  %v38_v10 = vld [vmem:[%s748_s0] sm:$0xff]  ;;  %vm50_vm1 = vcmask 261120   ;;  %v510_v11 = vpack.c.bf16 %v126_v9, %v125_v8  ;;  %v127_v12 = vld [vmem:[%s752_s4 + $0x10] sm:$0xff]  ;;  %vm140_vm2 = vcmask 523264  }
   0x7   :  { %v128_v13 = vld [vmem:[%s752_s4 + $0x18] sm:$0xff]  ;;  %v129_v15 = vld [vmem:[%s752_s4 + $0x20] sm:$0xff]  ;;  %v130_v16 = vld [vmem:[%s752_s4 + $0x28] sm:$0xff]  ;;  %vm396_vm3 = vcmask 130048   ;;  %vm232_vm4 = vcmask 64512  }
   0x8   :  { %508 = vmatpush3.bf16.msra.mxu1 %v507_v7  ;;  %v513_v14 = vpack.c.bf16 %v128_v13, %v127_v12  ;;  %v516_v17 = vpack.c.bf16 %v130_v16, %v129_v15  ;;  %v131_v18 = vld [vmem:[%s752_s4 + $0x30] sm:$0xff]  ;;  %v132_v19 = vld [vmem:[%s752_s4 + $0x38] sm:$0xff]  ;;  %v416_v21 = vld [vmem:[%s751_s3] ss:$0 sm:$0xff]  ;;  %s568_s4 = smov [#allocation2]  }
   0x9   :  { %509 = vmatprep.subr.bf16.mxu1 %v564_v3  ;;  %v519_v20 = vpack.c.bf16 %v132_v19, %v131_v18  ;;  %v418_v26 = vld [vmem:[%s753_s5] ss:$0 sm:$0xff]  ;;  %s567_s5 = smov 120   ;;  %v308_v36 = vld [vmem:[%s756_s8 + $0x8] sm:$0xff]  ;;  %v309_v41 = vld [vmem:[%s756_s8 + $0x10] sm:$0xff]  ;;  %s404_s26 = sshll.u32 %s568_s4, 4  ;;  %s405_s26 = int_to_ptr.vmem [resolvable:$true] %s404_s26 }
   0xa   :  { %v224_v32 = vld [vmem:[%s754_s6] sm:$0xff]  ;;  %v310_v42 = vld [vmem:[%s756_s8 + $0x18] sm:$0xff]  ;;  %v312_v45 = vld [vmem:[%s756_s8 + $0x28] sm:$0xff]  ;;  %p545_p1 = scmp.lt.s32.totalorder %s405_s26, %s405_s26 }
   0xb   :  { %458 = vmatmul.mubr.msk.f32.vlgmr.msra.gmra.mrb[0].mxu1 %vm50_vm1, %v38_v10  ;;  %480 = vmatpush3.msra.mxu0 %v224_v32  ;;  %v214_v34 = vld [vmem:[%s749_s1] sm:$0xff]  ;;  %v525_v43 = vpack.c.bf16 %v310_v42, %v309_v41  ;;  %v313_v47 = vld [vmem:[%s756_s8 + $0x30] sm:$0xff]  ;;  %v314_v48 = vld [vmem:[%s756_s8 + $0x38] sm:$0xff] }
   0xc   :  { %511 = vmatpush3.bf16.msra.mxu1 %v510_v11  ;;  %476 = vmatprep.mubr.msk.f32.mxu1 %vm565_vm0, %v566_v6  ;;  %v307_v35 = vld [vmem:[%s756_s8] sm:$0xff]  ;;  %v531_v49 = vpack.c.bf16 %v314_v48, %v313_v47 }
   0xd   :  { %512 = vmatprep.subr.bf16.mxu1 %v564_v3  ;;  %521 = vmatprep.subr.bf16.mxu0 %v564_v3  ;;  %v522_v39 = vpack.c.bf16 %v308_v36, %v307_v35  ;;  %v311_v44 = vld [vmem:[%s756_s8 + $0x20] sm:$0xff]  ;;  %s540_s8 = scalar_lea.vmem %s405_s26, 128 }
   0xe   :  { %v528_v46 = vpack.c.bf16 %v312_v45, %v311_v44  ;;  %v420_v50 = vld [vmem:[%s755_s7] ss:$0 sm:$0xff]  ;;  %p541_p0 = scmp.ne.s32.totalorder %s405_s26, %s540_s8  ;;  %p546_p2 = scmp.lt.s32.totalorder %s540_s8, %s540_s8 }
   0xf   :  { %v422_v55 = vld [vmem:[%s757_s9] ss:$0 sm:$0xff] }
  0x10   :  { %514 = vmatpush3.bf16.msra.mxu1 %v513_v14  ;;  %p547_p3 = por %p546_p2, %p545_p1 }
  0x11   :  { %515 = vmatprep.subr.bf16.mxu1 %v564_v3 }
  0x12   :  { %p548_p4 = pnand %p547_p3, %p541_p0 }
  0x14   :  { %517 = vmatpush3.bf16.msra.mxu1 %v516_v17 }
  0x15   :  { %518 = vmatprep.subr.bf16.mxu1 %v564_v3 }
  0x18   :  { %520 = vmatpush3.bf16.msra.mxu1 %v519_v20 }
  0xde   :  { %v120_v22 = vpop.f32.mrb[0].mxu1 }
  0xdf   :  { %v121_v23 = vadd.f32 %v416_v21, %v120_v22  ;;  %v459_v24 = vpop.f32.mrb[1].mxu1 }
  0xe1   :  { %v124_v25 = vmax.f32 %v121_v23, 0.0 }
  0xe3   :  { %477 = vmatmul.mubr.msk.f32.vlgmr.msra.gmra.mrb[2].mxu1 %vm140_vm2, %v124_v25 }
 0x1b6   :  { %v210_v27 = vpop.f32.mrb[2].mxu1 }
 0x1b7   :  { %v211_v28 = vadd.f32 %v418_v26, %v210_v27  ;;  %v478_v29 = vpop.f32.mrb[3].mxu1 }
 0x1b9   :  { %v215_v30 = vmul.f32 0.5, %v211_v28  ;;  %397 = vst.msk [vmem:[%s759_s11] sm:$0xff] %vm396_vm3, %v211_v28 }
 0x1bb   :  { %v216_v31 = vmul.f32 1.442695, %v215_v30 }
 0x1bd   :  { %538 = vpow2.f32 %v216_v31 }
 0x1c7   :  { %v539_v33 = vpop.eup %538 }
 0x1c8   :  { %219 = vrot.lane.b32.xlu0 %v539_v33, %s567_s5 }
 0x23a   :  { %v220_v37 = vpop.permute.xlu0 %219 }
 0x23b   :  { %v222_v38 = vmul.f32 %v220_v37, %v214_v34 }
 0x23d   :  { %v223_v40 = vadd.f32 %v222_v38, %v211_v28 }
 0x23f   :  { %482 = vmatmul.mubr.msk.f32.vlgmr.msra.gmra.mrb[0].mxu0 %vm232_vm4, %v223_v40 }
 0x240   :  { %523 = vmatpush3.bf16.msra.mxu0 %v522_v39  ;;  %500 = vmatprep.mubr.msk.f32.mxu0 %vm565_vm0, %v566_v6 }
 0x241   :  { %524 = vmatprep.subr.bf16.mxu0 %v564_v3 }
 0x244   :  { %526 = vmatpush3.bf16.msra.mxu0 %v525_v43 }
 0x245   :  { %527 = vmatprep.subr.bf16.mxu0 %v564_v3 }
 0x248   :  { %529 = vmatpush3.bf16.msra.mxu0 %v528_v46 }
 0x249   :  { %530 = vmatprep.subr.bf16.mxu0 %v564_v3 }
 0x24c   :  { %532 = vmatpush3.bf16.msra.mxu0 %v531_v49 }
 0x312   :  { %v302_v51 = vpop.f32.mrb[0].mxu0 }
 0x313   :  { %v303_v52 = vadd.f32 %v420_v50, %v302_v51  ;;  %v483_v53 = vpop.f32.mrb[1].mxu0 }
 0x315   :  { %v306_v54 = vmax.f32 %v303_v52, 0.0 }
 0x317   :  { %501 = vmatmul.mubr.msk.f32.vlgmr.msra.gmra.mrb[2].mxu0 %vm140_vm2, %v306_v54 }
 0x3ea   :  { %v391_v56 = vpop.f32.mrb[2].mxu0 }
 0x3eb   :  { %v392_v57 = vadd.f32 %v422_v55, %v391_v56  ;;  %v502_v58 = vpop.f32.mrb[3].mxu0 }
 0x3ed   :  { %395 = vst.msk [vmem:[#allocation2] sm:$0xff] %vm50_vm1, %v392_v57 }
 0x3ee   :  { %551 = shalt.err (!%p548_p4)
}
 0x3ef   :  { %s552_s27 = scalar_lea.hbm %s758_s10, 128 }
 0x3f0   :  { %p553_p5 = scmp.ne.s32.totalorder %s758_s10, %s552_s27  ;;  %p556_p6 = scmp.lt.u32.totalorder %s552_s27, %s758_s10 }
 0x3f2   :  { %p558_p7 = pnand %p556_p6, %p553_p5 }
 0x3f4   :  { %561 = shalt.err (!%p558_p7)
}
 0x3f5   :  { %407 = dma.vmem_to_hbm [thread:$0]  %s405_s26, 128, %s758_s10, [#allocation3]  }
 0x3f6   :  { %562 = dma.done.wait [#allocation3], 128  }
 0x3f7   :  { %563 = vsyncadd [#allocation3], 4294967168 }
 0x3f8   :  { %415 = vsyncpa [#allocation3], 1 }

</bundles_post_ra>
